<compile_context>
chip_gen: v6e
topology: v6e:2x2x1
jax: 0.10.0
libtpu: 0.0.40
codegen_flags: <defaults>
</compile_context>

<pallas_src>
import jax
import jax.numpy as jnp
from jax.experimental import pallas as pl
from jax.experimental.pallas import tpu as pltpu


# ---------------------------------------------------------------------------
# Pallas kernel: identity / copy-through-VMEM (placeholder for the empty
# Decoder.forward hot path).
# ---------------------------------------------------------------------------
def _copy_kernel(x_ref, o_ref):
    o_ref[...] = x_ref[...]


_LANE = 128
# Per-tile byte budget.  BlockSpec double-buffers input AND output, so the
# resident working set is ~ 2 * (in + out) * tile_bytes = 4 * tile_bytes.
# 3 MiB -> ~12 MiB, which fits v5e's 16 MiB default scoped VMEM and v7x's
# 32 MiB default (64 MiB physical) while staying large enough to amortize the
# ~0.35 us per-grid-step overhead on every chip.
_TILE_BUDGET_BYTES = 3 * 1024 * 1024
# Cap for the re-chunked lane width (elements) so row tiling still has rows.
_MAX_LANE_WIDTH = 64 * 1024


def _sublane_granule(itemsize: int) -> int:
    """Native packed sublane tile height per dtype width."""
    return {4: 8, 2: 16, 1: 32}.get(itemsize, 8)


def _lane_dense_2d(x: jax.Array) -> jax.Array:
    """Reshape x to a 2D (rows, width) slab with a lane-dense last dim.

    Prefers the original trailing dim when it is already a multiple of 128;
    otherwise re-chunks the flat array so the last dim is the widest multiple
    of 128 (capped) that divides the element count.
    """
    size = x.size
    h = x.shape[-1] if x.ndim >= 1 else 1
    if h >= _LANE and h % _LANE == 0:
        return x.reshape(size // h, h)
    if size % _LANE == 0:
        m = size // _LANE
        d_max = min(m, _MAX_LANE_WIDTH // _LANE)
        width = _LANE
        for d in range(d_max, 0, -1):
            if m % d == 0:
                width = _LANE * d
                break
        return x.reshape(size // width, width)
    # TODO(synk): last dim < 128 and size not a multiple of 128 -> the stores
    # will be masked (vst.msk); acceptable only for tiny fallback shapes.
    return x.reshape(size // h, h)


def _pick_row_tile(rows: int, width: int, itemsize: int) -> int:
    """Byte-budgeted, dtype-aware row tile for a (rows, width) slab."""
    gran = _sublane_granule(itemsize)
    pref = max(gran, 32)  # prefer multiples of 32 for packed layouts

    tile = _TILE_BUDGET_BYTES // max(1, width * itemsize)
    tile = min(tile, 1024)  # 512-1024 rows already reach ~85% of HBM roofline
    step = pref if tile >= pref else gran
    tile = max((tile // step) * step, gran)

    if tile >= rows:
        # Full slab fits in one tile.  If possible, still split into >=2 grid
        # steps so both TensorCores get work on v7x (megacore).
        if rows >= 2 * gran:
            half = (((rows + 1) // 2) + gran - 1) // gran * gran
            return min(half, rows)
        return rows  # full-extent block (exempt from the (8,128) rule)
    return tile


def copy_through_vmem(x: jax.Array, *, run_kernel: bool = True) -> jax.Array:
    """Identity copy through VMEM using large, lane-dense 2D tiles.

    With run_kernel=False (the recommended production setting for a no-op
    forward) the input is returned as-is: the fastest identity is no kernel
    at all, since even an aliased copy costs a full HBM read + write.
    """
    if not run_kernel or x.size == 0:
        return x

    orig_shape = x.shape
    x2d = _lane_dense_2d(x)
    rows, width = x2d.shape

    tile_rows = _pick_row_tile(rows, width, x.dtype.itemsize)
    grid = (pl.cdiv(rows, tile_rows),)   # partial last block is masked by Pallas

    y2d = pl.pallas_call(
        _copy_kernel,
        out_shape=jax.ShapeDtypeStruct((rows, width), x.dtype),
        grid=grid,
        in_specs=[pl.BlockSpec((tile_rows, width), lambda i: (i, 0))],
        out_specs=pl.BlockSpec((tile_rows, width), lambda i: (i, 0)),
        # Output aliases the input: no extra HBM output allocation; becomes a
        # true in-place pass when the caller donates the argument.
        input_output_aliases={0: 0},
        compiler_params=pltpu.CompilerParams(
            dimension_semantics=("parallel",),
            # Headroom over the v5e 16 MiB default scoped limit; well inside
            # v7x's 64 MiB physical VMEM.
            vmem_limit_bytes=32 << 20,
        ),
    )(x2d)
    return y2d.reshape(orig_shape)


# ---------------------------------------------------------------------------
# Decoder module equivalent.
# ---------------------------------------------------------------------------
class Decoder:
    """JAX equivalent of the (stub) PyTorch Decoder."""

    def __init__(self, emb_dim, hid_dim, output_dim, dropout):
        # Reference __init__ declares no layers / parameters.
        self.emb_dim = emb_dim
        self.hid_dim = hid_dim
        self.output_dim = output_dim
        self.dropout = dropout
        # TODO(synk): reference Decoder defines no embedding/LSTM/fc/dropout
        # layers; nothing to initialize.

    def forward(self, trg, hidden, cell):
        # Matches `def forward(self, trg, hidden, cell): pass` -> returns None.
        # TODO(synk): reference forward is empty; no decoder computation to
        # translate into a Pallas kernel.
        return None

    __call__ = forward


if __name__ == "__main__":
    # Small shapes consistent with the module signature.
    emb_dim, hid_dim, output_dim, dropout = 32, 128, 64, 0.1
    batch = 2

    key = jax.random.PRNGKey(0)
    k_trg, k_hid, k_cell = jax.random.split(key, 3)
    trg = jax.random.randint(k_trg, (batch,), 0, output_dim, dtype=jnp.int32)
    hidden = jax.random.normal(k_hid, (batch, hid_dim), dtype=jnp.float32)
    cell = jax.random.normal(k_cell, (batch, hid_dim), dtype=jnp.float32)

    # Faithful forward of the (empty) reference module.
    dec = Decoder(emb_dim, hid_dim, output_dim, dropout)
    out = dec(trg, hidden, cell)
    assert out is None  # exactly like the PyTorch stub

    # Demonstration run of the optimized Pallas placeholder kernel on the
    # decoder state tensors (stacked hidden & cell -> lane-dense 2D slab).
    state = jnp.stack([hidden, cell], axis=0)          # (2, batch, hid_dim)
    state_host = jax.device_get(state)                 # snapshot (aliasing may donate)

    y = copy_through_vmem(state, run_kernel=True)
    jax.block_until_ready(y)
    assert y.shape == state.shape and y.dtype == state.dtype
    assert bool(jnp.array_equal(y, jnp.asarray(state_host)))

    # Awkward row count -> exercises the cdiv grid, partial last block, and
    # the >=2-step megacore split.
    z = jax.random.normal(key, (40, hid_dim), dtype=jnp.float32)
    z_host = jax.device_get(z)
    yz = copy_through_vmem(z, run_kernel=True)
    jax.block_until_ready(yz)
    assert bool(jnp.array_equal(yz, jnp.asarray(z_host)))

    # Production fast path: elide the kernel entirely for the no-op forward.
    assert copy_through_vmem(state, run_kernel=False) is state

    print("KERNEL_OK")
</pallas_src>

<mosaic_0001>
module attributes {stable_mosaic.version = 11 : i64} {
  func.func @_copy_kernel(%arg0: i32, %arg1: memref<4x128xf32, #tpu.memory_space<vmem>>, %arg2: memref<4x128xf32, #tpu.memory_space<vmem>>) attributes {dimension_semantics = [#tpu.dimension_semantics<parallel>], iteration_bounds = array<i64: 1>, scalar_prefetch = 0 : i64, scratch_operands = 0 : i64, tpu.core_type = #tpu.core_type<tc>, window_params = [{transform_indices = @transform_0, window_bounds = array<i64: 4, 128>}, {transform_indices = @transform_1, window_bounds = array<i64: 4, 128>}]} {
    %c0 = arith.constant 0 : index
    %c0_0 = arith.constant 0 : index
    %0 = vector.load %arg1[%c0, %c0_0] : memref<4x128xf32, #tpu.memory_space<vmem>>, vector<4x128xf32>
    %c0_1 = arith.constant 0 : index
    %c0_2 = arith.constant 0 : index
    %1 = vector.load %arg2[%c0_1, %c0_2] : memref<4x128xf32, #tpu.memory_space<vmem>>, vector<4x128xf32>
    tpu.vector_store %arg2[%c0_1, %c0_2], %0 {strides = array<i32>} : memref<4x128xf32, #tpu.memory_space<vmem>>, vector<4x128xf32>,
    return
  }
  func.func @transform_0(%arg0: i32) -> (i32, i32) {
    %c0_i32 = arith.constant 0 : i32
    %c0_i32_0 = arith.constant 0 : i32
    return %arg0, %c0_i32 : i32, i32
  }
  func.func @transform_1(%arg0: i32) -> (i32, i32) {
    %c0_i32 = arith.constant 0 : i32
    %c0_i32_0 = arith.constant 0 : i32
    return %arg0, %c0_i32 : i32, i32
  }
}

</mosaic_0001>

<bundles_post_ra>
// kernel: tpu_custom_call.1
= control target key start
LH: loop header
LB: loop body
LE: loop exit
PB: predicated region body
PF: predicated region fallthrough
CT: control target
= control target key end

     0   :  { %6 = vsyncpa [#allocation3], 0  ;;  %s102_s0 = inlined_call_operand.hbm [shape: f32[4,128], index: 0, kind: input, shape index: {}, may-alias: {0,1}]   ;;  %s103_s1 = inlined_call_operand.hbm [shape: f32[4,128], index: 1, kind: output, shape index: {}, may-alias: {0,1}]  }
   0x1   :  { %7 = vsyncpa [#allocation4], 0  ;;  %s84_s6 = smov [#allocation2]  }
   0x2   :  { %s14_s7 = sshll.u32 %s84_s6, 4  ;;  %s15_s7 = int_to_ptr.vmem [resolvable:$true] %s14_s7 }
   0x3   :  { %s48_s8 = scalar_lea.vmem %s15_s7, 64  ;;  %p53_p1 = scmp.lt.s32.totalorder %s15_s7, %s15_s7 }
   0x4   :  { %p49_p0 = scmp.ne.s32.totalorder %s15_s7, %s48_s8  ;;  %p54_p2 = scmp.lt.s32.totalorder %s48_s8, %s48_s8 }
   0x6   :  { %p55_p3 = por %p54_p2, %p53_p1 }
   0x8   :  { %p56_p4 = pnand %p55_p3, %p49_p0 }
   0xa   :  { %59 = shalt.err (!%p56_p4)
}
   0xb   :  { %17 = dma.hbm_to_vmem [thread:$0]  %s102_s0, 64, %s15_s7, [#allocation3]  }
   0xc   :  { %80 = dma.done.wait [#allocation3], 64  }
   0xd   :  { %81 = vsyncadd [#allocation3], 4294967232  ;;  %s85_s11 = smov [#allocation5]   ;;  %v21_v0 = vld [vmem:[#allocation2] sm:$0xf] }
   0xe   :  { %s29_s12 = sshll.u32 %s85_s11, 4  ;;  %22 = vst [vmem:[#allocation5] sm:$0xf] %v21_v0  ;;  %s30_s12 = int_to_ptr.vmem [resolvable:$true] %s29_s12 }
   0xf   :  { %s60_s13 = scalar_lea.vmem %s30_s12, 64  ;;  %p65_p6 = scmp.lt.s32.totalorder %s30_s12, %s30_s12 }
  0x10   :  { %p61_p5 = scmp.ne.s32.totalorder %s30_s12, %s60_s13  ;;  %p66_p7 = scmp.lt.s32.totalorder %s60_s13, %s60_s13 }
  0x12   :  { %p67_p8 = por %p66_p7, %p65_p6 }
  0x14   :  { %p68_p9 = pnand %p67_p8, %p61_p5 }
  0x16   :  { %71 = shalt.err (!%p68_p9)
}
  0x17   :  { %32 = dma.vmem_to_hbm [thread:$0]  %s30_s12, 64, %s103_s1, [#allocation4]  }
  0x18   :  { %82 = dma.done.wait [#allocation4], 64  }
  0x19   :  { %83 = vsyncadd [#allocation4], 4294967232 }
  0x1a   :  { %36 = vsyncpa [#allocation3], 1 }
  0x1b   :  { %37 = vsyncpa [#allocation4], 1 }

</bundles_post_ra>
